<compile_context>
chip_gen: v7x
topology: tpu7x:2x2x1
jax: 0.10.0
libtpu: 0.0.40
codegen_flags: <defaults>
</compile_context>

<pallas_src>
import math

import jax
import jax.numpy as jnp
from jax import lax
from jax.experimental import pallas as pl
from jax.experimental.pallas import tpu as pltpu


def _round_up(x, m):
    return ((x + m - 1) // m) * m


def _make_kernel(tm, tn):
    def kernel(y_rows_ref, y_cols_ref, yhat_ref, o_ref):
        """One grid step = one (tm, tn) tile of the Gram matrix.

        y_rows_ref : (tm, Dp)  VMEM — row slab of y   (block (i, 0))
        y_cols_ref : (tn, Dp)  VMEM — column slab of y (block (j, 0))
        yhat_ref   : (tm, tn)  VMEM — matching tile of y_hat (block (i, j))
        o_ref      : (8, 128)  VMEM — lane-dense per-tile partial sums
        """
        # MXU: contract the last dim of both operands (y_rows @ y_cols.T) — no transpose.
        gram = lax.dot_general(
            y_rows_ref[...],
            y_cols_ref[...],
            dimension_numbers=(((1,), (1,)), ((), ())),
            preferred_element_type=jnp.float32,
        )                                                         # (tm, tn) f32

        diff = jnp.abs(gram - yhat_ref[...].astype(jnp.float32))  # VPU

        # Fold tm rows down to 8 sublanes: reshape only splits the leading dim
        # (layout-trivial), the sum is pure elementwise VPU adds.
        folded = jnp.sum(diff.reshape(tm // 8, 8, tn), axis=0)    # (8, tn)

        # Fold lane groups down to one (8, 128) vreg slab: 128-aligned slices select
        # whole vregs -> pure VPU adds, no XLU.
        acc = folded[:, 0:128]
        for c in range(1, tn // 128):
            acc = acc + folded[:, c * 128:(c + 1) * 128]
        o_ref[...] = acc

    return kernel


def simple_mse_loss(y, y_hat, *, tm=256, tn=256, use_bf16=True):
    """Pallas equivalent of SimpleMSELoss.forward: sum(|y @ y.T - y_hat|)."""
    N, D = y.shape
    assert y_hat.shape == (N, N)

    # Tile sizes: tm a multiple of 8 sublanes, tn a multiple of 128 lanes.
    tm = max(8, (int(tm) // 8) * 8)
    tn = max(128, (int(tn) // 128) * 128)

    # Zero-pad: rows/cols of zeros contribute exactly 0 to the sum, zero columns of y
    # don't change y @ y.T.  N padded so both tilings divide it; D padded lane-dense.
    Np = _round_up(N, math.lcm(tm, tn))
    Dp = _round_up(D, 128)
    if (Np, Dp) != (N, D):
        y = jnp.pad(y, ((0, Np - N), (0, Dp - D)))
    if Np != N:
        y_hat = jnp.pad(y_hat, ((0, Np - N), (0, Np - N)))

    # bf16 matmul operands (f32 accumulation) keep the MXU off the critical path on v5e
    # and halve y's DMA/VMEM footprint.
    y_mm = y.astype(jnp.bfloat16) if use_bf16 else y

    ni = Np // tm
    nj = Np // tn

    partials = pl.pallas_call(
        _make_kernel(tm, tn),
        out_shape=jax.ShapeDtypeStruct((ni * 8, nj * 128), jnp.float32),
        grid_spec=pltpu.PrefetchScalarGridSpec(
            num_scalar_prefetch=0,
            grid=(ni, nj),
            in_specs=[
                pl.BlockSpec((tm, Dp), lambda i, j: (i, 0)),   # y rows   (constant over j)
                pl.BlockSpec((tn, Dp), lambda i, j: (j, 0)),   # y cols
                pl.BlockSpec((tm, tn), lambda i, j: (i, j)),   # streaming y_hat tile
            ],
            out_specs=pl.BlockSpec((8, 128), lambda i, j: (i, j)),  # lane-dense partials
        ),
        compiler_params=pltpu.CompilerParams(
            dimension_semantics=("parallel", "parallel"),  # disjoint outputs -> megacore OK
            vmem_limit_bytes=48 * 1024 * 1024,             # headroom on v7x's 64 MiB VMEM
        ),
    )(y_mm, y_mm, y_hat)

    # Single cross-lane reduction, outside the kernel loop.
    return jnp.sum(partials)


if __name__ == "__main__":
    key = jax.random.PRNGKey(0)
    k1, k2, k3, k4 = jax.random.split(key, 4)

    # Primary test: aligned shapes, 2x2 grid with the default 256x256 Gram tiles.
    N, D = 512, 128
    y = jax.random.normal(k1, (N, D), dtype=jnp.float32)
    y_hat = jax.random.normal(k2, (N, N), dtype=jnp.float32)

    loss = jax.block_until_ready(simple_mse_loss(y, y_hat))
    ref = jnp.sum(jnp.abs(y @ y.T - y_hat))
    assert jnp.allclose(loss, ref, rtol=1e-3, atol=1e-1), (loss, ref)

    # Ragged test: exercises the N and D zero-padding paths (N=48, D=32).
    N2, D2 = 48, 32
    y2 = jax.random.normal(k3, (N2, D2), dtype=jnp.float32)
    y_hat2 = jax.random.normal(k4, (N2, N2), dtype=jnp.float32)

    loss2 = jax.block_until_ready(simple_mse_loss(y2, y_hat2, tm=32, tn=128))
    ref2 = jnp.sum(jnp.abs(y2 @ y2.T - y_hat2))
    assert jnp.allclose(loss2, ref2, rtol=1e-3, atol=1e-1), (loss2, ref2)

    # f32 matmul path sanity check (no bf16 cast).
    loss3 = jax.block_until_ready(simple_mse_loss(y2, y_hat2, tm=32, tn=128, use_bf16=False))
    assert jnp.allclose(loss3, ref2, rtol=1e-4, atol=1e-2), (loss3, ref2)

    print("KERNEL_OK")
</pallas_src>

<mosaic_0001>
module attributes {stable_mosaic.version = 11 : i64} {
  func.func @kernel(%arg0: i32, %arg1: i32, %arg2: memref<256x128xbf16, #tpu.memory_space<vmem>>, %arg3: memref<256x128xbf16, #tpu.memory_space<vmem>>, %arg4: memref<256x256xf32, #tpu.memory_space<vmem>>, %arg5: memref<8x128xf32, #tpu.memory_space<vmem>>) attributes {dimension_semantics = [#tpu.dimension_semantics<parallel>, #tpu.dimension_semantics<parallel>], iteration_bounds = array<i64: 2, 2>, scalar_prefetch = 0 : i64, scratch_operands = 0 : i64, tpu.core_type = #tpu.core_type<tc>, window_params = [{transform_indices = @transform_0, window_bounds = array<i64: 256, 128>}, {transform_indices = @transform_1, window_bounds = array<i64: 256, 128>}, {transform_indices = @transform_2, window_bounds = array<i64: 256, 256>}, {transform_indices = @transform_3, window_bounds = array<i64: 8, 128>}]} {
    %c0 = arith.constant 0 : index
    %c0_0 = arith.constant 0 : index
    %0 = vector.load %arg2[%c0, %c0_0] : memref<256x128xbf16, #tpu.memory_space<vmem>>, vector<256x128xbf16>
    %c0_1 = arith.constant 0 : index
    %c0_2 = arith.constant 0 : index
    %1 = vector.load %arg3[%c0_1, %c0_2] : memref<256x128xbf16, #tpu.memory_space<vmem>>, vector<256x128xbf16>
    %cst = arith.constant dense<0.000000e+00> : vector<256x256xf32>
    %2 = tpu.matmul %0, %1, %cst {dimension_numbers = #tpu.dot_dimension_numbers<[1], [1], [0], [0], [0, 0, 1, 0], [], []>} : vector<256x128xbf16>, vector<256x128xbf16>, vector<256x256xf32> -> vector<256x256xf32>
    %c0_3 = arith.constant 0 : index
    %c0_4 = arith.constant 0 : index
    %3 = vector.load %arg4[%c0_3, %c0_4] : memref<256x256xf32, #tpu.memory_space<vmem>>, vector<256x256xf32>
    %4 = arith.subf %2, %3 : vector<256x256xf32>
    %5 = math.absf %4 : vector<256x256xf32>
    %6 = vector.shape_cast %5 : vector<256x256xf32> to vector<32x8x256xf32>
    %cst_5 = arith.constant dense<0.000000e+00> : vector<8x256xf32>
    %7 = vector.multi_reduction <add>, %6, %cst_5 [0] : vector<32x8x256xf32> to vector<8x256xf32>
    %8 = vector.extract_strided_slice %7 {offsets = [0, 0], sizes = [8, 128], strides = [1, 1]} : vector<8x256xf32> to vector<8x128xf32>
    %9 = vector.extract_strided_slice %7 {offsets = [0, 128], sizes = [8, 128], strides = [1, 1]} : vector<8x256xf32> to vector<8x128xf32>
    %10 = arith.addf %8, %9 : vector<8x128xf32>
    %c0_6 = arith.constant 0 : index
    %c0_7 = arith.constant 0 : index
    %11 = vector.load %arg5[%c0_6, %c0_7] : memref<8x128xf32, #tpu.memory_space<vmem>>, vector<8x128xf32>
    tpu.vector_store %arg5[%c0_6, %c0_7], %10 {strides = array<i32>} : memref<8x128xf32, #tpu.memory_space<vmem>>, vector<8x128xf32>,
    return
  }
  func.func @transform_0(%arg0: i32, %arg1: i32) -> (i32, i32) {
    %c0_i32 = arith.constant 0 : i32
    %c0_i32_0 = arith.constant 0 : i32
    return %arg0, %c0_i32 : i32, i32
  }
  func.func @transform_1(%arg0: i32, %arg1: i32) -> (i32, i32) {
    %c0_i32 = arith.constant 0 : i32
    %c0_i32_0 = arith.constant 0 : i32
    return %arg1, %c0_i32 : i32, i32
  }
  func.func @transform_2(%arg0: i32, %arg1: i32) -> (i32, i32) {
    %c0_i32 = arith.constant 0 : i32
    return %arg0, %arg1 : i32, i32
  }
  func.func @transform_3(%arg0: i32, %arg1: i32) -> (i32, i32) {
    %c0_i32 = arith.constant 0 : i32
    return %arg0, %arg1 : i32, i32
  }
}

</mosaic_0001>

<bundles_post_ra>
// kernel: tpu_custom_call.1
= control target key start
LH: loop header
LB: loop body
LE: loop exit
PB: predicated region body
PF: predicated region fallthrough
CT: control target
= control target key end

     0   :  { %s2334_s0 = inlined_call_operand.hbm [shape: bf16[512,128], index: 0, kind: input, shape index: {}]   ;;  %s2335_s1 = inlined_call_operand.hbm [shape: bf16[512,128], index: 1, kind: input, shape index: {}]   ;;  %s2336_s2 = inlined_call_operand.hbm [shape: f32[512,512], index: 2, kind: input, shape index: {}]   ;;  %s2337_s3 = inlined_call_operand.hbm [shape: f32[16,256], index: 3, kind: output, shape index: {}]  }
   0x1   :  { %2350 = sst [smem:[#allocation20_spill]] %s2334_s0 }
   0x2   :  { %2351 = sst [smem:[#allocation21_spill]] %s2335_s1 }
   0x3   :  { %2352 = sst [smem:[#allocation22_spill]] %s2337_s3 }
   0x4   :  { %8 = vsyncpa [#allocation3], 0 }
   0x5   :  { %10 = vsyncpa [#allocation3 + $0x1], 0 }
   0x6   :  { %11 = vsyncpa [#allocation6], 0 }
   0x7   :  { %13 = vsyncpa [#allocation6 + $0x1], 0 }
   0x8   :  { %14 = vsyncpa [#allocation4], 0 }
   0x9   :  { %16 = vsyncpa [#allocation4 + $0x1], 0  ;;  %s1712_s12 = smov 0   ;;  %s1714_s13 = smov 0  }
   0xa   :  { %s1716_s14 = smov 0   ;;  %s1718_s15 = smov 0  }
   0xb   :  { %s1720_s16 = smov 0   ;;  %s1722_s17 = smov 0  }
   0xc   :  { %s1724_s18 = smov 0   ;;  %s1726_s19 = smov 0  }
   0xd   :  { %s1728_s20 = smov 0   ;;  %s1730_s21 = smov 0  }
   0xe   :  { %s1732_s22 = smov 0   ;;  %s1734_s23 = smov 0  }
   0xf   :  { %s1736_s24 = smov 0   ;;  %s1738_s25 = smov 0  }
  0x10 LB: > { %2353 = sst [smem:[#allocation13_spill]] %s1649_s17  ;;  %s1781_s26 = sadd.s32 4294967295, %s1681_s25   ;;  %s1681_s25 = sphi %s1738_s25, %s22_s25   ;;  %s1677_s24 = sphi %s1736_s24, %s2411_s24   ;;  %s1673_s23 = sphi %s1734_s23, %s2410_s23   ;;  %s1669_s22 = sphi %s1732_s22, %s2409_s22   ;;  %s1665_s21 = sphi %s1730_s21, %s2408_s21   ;;  %s1661_s20 = sphi %s1728_s20, %s2407_s20   ;;  %s1657_s19 = sphi %s1726_s19, %s2406_s19   ;;  %s1653_s18 = sphi %s1724_s18, %s2405_s18   ;;  %s1649_s17 = sphi %s1722_s17, %s2396_s17   ;;  %s1645_s16 = sphi %s1720_s16, %s2404_s16   ;;  %s1641_s15 = sphi %s1718_s15, %s2403_s15   ;;  %s1637_s14 = sphi %s1716_s14, %s2402_s14   ;;  %s1633_s13 = sphi %s1714_s13, %s2401_s13   ;;  %s1629_s12 = sphi %s1712_s12, %s2400_s12  }
  0x11   : > { %2354 = sst [smem:[#allocation14_spill]] %s1665_s21  ;;  %s31_s27 = sadd.s32 1, %s1673_s23 }
  0x12   : > { %2355 = sst [smem:[#allocation15_spill]] %s1669_s22  ;;  %p1784_p0 = scmp.ge.s32.totalorder %s31_s27, 2 }
  0x13   : > { %p2343_p1 = scmp.eq.s32.totalorder %s1681_s25, 0  ;;  %p2342_p2 = scmp.eq.s32.totalorder %s1781_s26, 0 }
  0x14   : > { %s67_s29 = sadd.s32 1, %s1649_s17  ;;  %s2413_s27 = smov (%p1784_p0, %s31_s27), 0 }
  0x15   : > { %2357 = sst [smem:[#allocation16_spill]] %s2413_s27  ;;  %p74_p3 = scmp.ne.s32.totalorder %s1649_s17, %s1645_s16 }
  0x16   : > { %p80_p4 = scmp.ne.s32.totalorder %s1645_s16, %s1641_s15  ;;  %s1800_s30 = ssub.s32 %s1673_s23, %s2413_s27 }
  0x17   : > { %p65_p6 = scmp.eq.s32.totalorder %s1800_s30, 0  ;;  %p76_p7 = por %p74_p3, %p2343_p1 }
  0x18   : > { %p1808_p8 = por %p80_p4, %p2342_p2  ;;  %p2341_p9 = scmp.lt.s32.totalorder %s1681_s25, 4 }
  0x19   : > { %s1813_s5 = scalar_select %p65_p6, %s1649_s17, %s67_s29  }
  0x1a   : > { %s2358_s4 = scalar_select %p1808_p8, 1, 0 }
  0x1b   : > { %2359 = sst [smem:[#allocation17_spill]] %s1813_s5  ;;  %s181_s6 = sand.u32 1, %s1681_s25  }
  0x1c   : > { %s183_s7 = sand.u32 1, %s1649_s17   ;;  %s1198_s9 = sshll.u32 %s1673_s23, 11 }
  0x1d   : > { %s1147_s8 = sshll.u32 %s183_s7, 7  ;;  %s2360_s1 = sld [smem:[#allocation21_spill]] }
  0x1e   : > { %s185_s27 = scalar_lea.vmem [#allocation5], %s1147_s8  ;;  %p1826_p10 = pnand %p2341_p9, %p76_p7 }
  0x1f   : > { %s192_s3 = sshll.u32 %s185_s27, 4  ;;  %s1834_s10 = scalar_lea.sflag [#allocation6], %s181_s6  ;;  %s1830_s3 = int_to_ptr.vmem [resolvable:$true] %s192_s3 }
  0x20   : > { %p1439_p13 = pneg %p1826_p10 }
  0x23   : > { %s1822_s15 = scalar_lea.hbm %s2360_s1, %s1198_s9  ;;  %s1442_s11 = scalar_lea.hbm %s2360_s1, 4096 }
  0x24   : > { %s1437_s9 = scalar_lea.hbm %s1822_s15, 2048  ;;  %p1443_p6 = scmp.lt.u32.totalorder %s1822_s15, %s2360_s1 }
  0x25   : > { %p1438_p12 = scmp.ne.s32.totalorder %s1822_s15, %s1437_s9  ;;  %p1444_p7 = scmp.lt.u32.totalorder %s1442_s11, %s1437_s9 }
  0x26   : > { %p1446_p9 = scmp.lt.u32.totalorder %s1437_s9, %s1822_s15 }
  0x27   : > { %p1440_p3 = pnand %p1439_p13, %p1438_p12  ;;  %p1445_p5 = por %p1444_p7, %p1443_p6 }
  0x29   : > { %p1441_p4 = pneg %p1440_p3  ;;  %p1447_p2 = por %p1446_p9, %p1445_p5 }
  0x2b   : > { %p1448_p1 = pnand %p1447_p2, %p1441_p4 }
  0x2d   : > { %1451 = shalt.err (!%p1448_p1)
}
  0x2e   : > { %s1452_s6 = scalar_lea.vmem %s1830_s3, 2048  ;;  %s1683_s27 = smov [#allocation5]  }
  0x2f   : > { %p1453_p12 = scmp.ne.s32.totalorder %s1830_s3, %s1452_s6  ;;  %s1457_s8 = sshll.u32 %s1683_s27, 4  ;;  %s1458_s8 = int_to_ptr.vmem [resolvable:$false] %s1457_s8 }
  0x30   : > { %s1459_s17 = scalar_lea.vmem %s1458_s8, 4096  ;;  %p1460_p8 = scmp.lt.s32.totalorder %s1830_s3, %s1458_s8 }
  0x31   : > { %p1455_p3 = pnand %p1453_p12, %p1439_p13  ;;  %p1461_p6 = scmp.lt.s32.totalorder %s1459_s17, %s1452_s6 }
  0x33   : > { %p1456_p11 = pneg %p1455_p3  ;;  %p1462_p7 = por %p1461_p6, %p1460_p8 }
  0x35   : > { %p1463_p5 = pnand %p1462_p7, %p1456_p11 }
  0x37   : > { %1466 = shalt.err (!%p1463_p5)
}
  0x38   : > { %s2345_s5 = smov 64   ;;  %s2346_s9 = smov 4  }
  0x39   : > { %1278 = dma.hbm_to_vmem [thread:$0]  (!%p1826_p10), %s1822_s15, 2048, %s1830_s3, %s1834_s10, %s2345_s5, %s2345_s5, %s2346_s9  }
  0x3a   : > { %p224_p1 = scmp.lt.s32.totalorder %s1681_s25, 5  ;;  %p2362_p2 = scmp.ge.s32.totalorder %s1681_s25, 1 }
  0x3b   : > { %s34_s6 = sadd.s32 1, %s1677_s24  ;;  %s41_s27 = sadd.s32 1, %s1661_s20 }
  0x3c   : > { %p1868_p8 = pnand %p2362_p2, %p224_p1  ;;  %s2415_s6 = smov (!%p1784_p0, %s34_s6), %s1677_s24 }
  0x3d   : > { %p48_p9 = scmp.ne.s32.totalorder %s1661_s20, %s1657_s19  ;;  %p54_p11 = scmp.ne.s32.totalorder %s1657_s19, %s1653_s18 }
  0x3e   : > { %s2363_s11 = scalar_select %p1868_p8, 1, 0 }
  0x3f   : > { %p36_p13 = scmp.ge.s32.totalorder %s2415_s6, 2  ;;  %s160_s29 = sand.u32 1, %s1661_s20  }
  0x40   : > { %p2364_p4 = scmp.eq.s32.totalorder %s1681_s25, 0  ;;  %p2366_p12 = scmp.eq.s32.totalorder %s1781_s26, 0 }
  0x41   : > { %s2417_s6 = smov (%p36_p13, %s2415_s6), 0  ;;  %s1144_s28 = sshll.u32 %s160_s29, 7 }
  0x42   : > { %p1884_p10 = por %p2364_p4, %p48_p9  ;;  %p1890_p3 = por %p2366_p12, %p54_p11 }
  0x43   : > { %2368 = sst [smem:[#allocation18_spill]] %s2417_s6  ;;  %s38_s8 = ssub.s32 %s1677_s24, %s2417_s6 }
  0x44   : > { %s2367_s15 = scalar_select %p1890_p3, 1, 0 }
  0x45   : > { %p39_p0 = scmp.eq.s32.totalorder %s38_s8, 0  ;;  %s92_s18 = sor.u32 %s1800_s30, %s38_s8 }
  0x46   : > { %p1899_p6 = scmp.eq.s32.totalorder %s92_s18, 0  ;;  %s1197_s7 = sshll.u32 %s1677_s24, 11 }
  0x47   : > { %s1905_s5 = scalar_select %p39_p0, %s1661_s20, %s41_s27  }
  0x48   : > { %s2371_s0 = sld [smem:[#allocation20_spill]]  ;;  %s164_s22 = scalar_lea.vmem [#allocation2], %s1144_s28 }
  0x49   : > { %2370 = sst [smem:[#allocation19_spill]] %s1905_s5  ;;  %s171_s6 = sshll.u32 %s164_s22, 4  ;;  %s1912_s6 = int_to_ptr.vmem [resolvable:$true] %s171_s6 }
  0x4a   : > { %p2372_p7 = scmp.lt.s32.totalorder %s1681_s25, 4  ;;  %s1922_s27 = scalar_lea.sflag [#allocation3], %s160_s29 }
  0x4c   : > { %p1918_p5 = pnand %p2372_p7, %p1884_p10 }
  0x4e   : > { %s1910_s21 = scalar_lea.hbm %s2371_s0, %s1197_s7  ;;  %p1469_p2 = pneg %p1918_p5 }
  0x4f   : > { %s1467_s1 = scalar_lea.hbm %s1910_s21, 2048  ;;  %s1472_s9 = scalar_lea.hbm %s2371_s0, 4096 }
  0x50   : > { %p1468_p1 = scmp.ne.s32.totalorder %s1910_s21, %s1467_s1  ;;  %p1473_p13 = scmp.lt.u32.totalorder %s1910_s21, %s2371_s0 }
  0x51   : > { %p1474_p4 = scmp.lt.u32.totalorder %s1472_s9, %s1467_s1  ;;  %p1476_p12 = scmp.lt.u32.totalorder %s1467_s1, %s1910_s21 }
  0x52   : > { %p1470_p9 = pnand %p1469_p2, %p1468_p1 }
  0x53   : > { %p1475_p10 = por %p1474_p4, %p1473_p13 }
  0x54   : > { %p1471_p11 = pneg %p1470_p9 }
  0x55   : > { %p1477_p0 = por %p1476_p12, %p1475_p10 }
  0x57   : > { %p1478_p7 = pnand %p1477_p0, %p1471_p11 }
  0x59   : > { %1481 = shalt.err (!%p1478_p7)
}
  0x5a   : > { %s1482_s29 = scalar_lea.vmem %s1912_s6, 2048  ;;  %s1686_s8 = smov [#allocation2]  }
  0x5b   : > { %p1483_p1 = scmp.ne.s32.totalorder %s1912_s6, %s1482_s29  ;;  %s1487_s18 = sshll.u32 %s1686_s8, 4  ;;  %s1488_s18 = int_to_ptr.vmem [resolvable:$false] %s1487_s18 }
  0x5c   : > { %s1489_s22 = scalar_lea.vmem %s1488_s18, 4096  ;;  %p1490_p8 = scmp.lt.s32.totalorder %s1912_s6, %s1488_s18 }
  0x5d   : > { %p1485_p9 = pnand %p1483_p1, %p1469_p2  ;;  %p1491_p13 = scmp.lt.s32.totalorder %s1489_s22, %s1482_s29 }
  0x5f   : > { %p1486_p3 = pneg %p1485_p9  ;;  %p1492_p4 = por %p1491_p13, %p1490_p8 }
  0x61   : > { %p1493_p10 = pnand %p1492_p4, %p1486_p3 }
  0x63   : > { %1496 = shalt.err (!%p1493_p10)
}
  0x64   : > { %s2374_s1 = smov 4   ;;  %s2375_s7 = smov 64  }
  0x65   : > { %1275 = dma.hbm_to_vmem [thread:$0]  (!%p1918_p5), %s1910_s21, 2048, %s1912_s6, %s1922_s27, %s2375_s7, %s2375_s7, %s2374_s1  }
  0x66   : > { %s1141_s30 = sadd.s32 4294967294, %s1681_s25   ;;  %s95_s9 = sadd.s32 1, %s1637_s14 }
  0x67   : > { %p102_p8 = scmp.ne.s32.totalorder %s1637_s14, %s1633_s13  ;;  %p2376_p3 = scmp.eq.s32.totalorder %s1681_s25, 0 }
  0x68   : > { %s1960_s3 = scalar_select %p1899_p6, %s1637_s14, %s95_s9  }
  0x69   : > { %p1964_p2 = por %p102_p8, %p2376_p3  ;;  %p108_p11 = scmp.ne.s32.totalorder %s1633_s13, %s1629_s12 }
  0x6a   : > { %p2378_p12 = scmp.eq.s32.totalorder %s1781_s26, 3  ;;  %p140_p5 = scmp.eq.s32.totalorder %s1141_s30, 3 }
  0x6b   : > { %p2380_p7 = scmp.eq.s32.totalorder %s1781_s26, 0  ;;  %s204_s6 = sand.u32 1, %s1637_s14  }
  0x6c   : > { %p1972_p0 = por %p2378_p12, %p102_p8  ;;  %p1983_p6 = por %p140_p5, %p108_p11 }
  0x6d   : > { %p1978_p1 = por %p108_p11, %p2380_p7  ;;  %s1150_s27 = sshll.u32 %s204_s6, 9 }
  0x6e   : > { %s2379_s29 = scalar_select %p1972_p0, 1, 0 }
  0x6f   : > { %s2382_s17 = scalar_select %p1983_p6, 1, 0 }
  0x70   : > { %s1199_s8 = sshll.u32 %s1677_s24, 7  ;;  %s2383_s18 = sshll.u32 %s1673_s23, 1 }
  0x71   : > { %s213_s22 = sadd.s32 %s1199_s8, %s2383_s18  ;;  %s206_s1 = scalar_lea.vmem [#allocation7], %s1150_s27 }
  0x72   : > { %s216_s7 = sshll.u32 %s206_s1, 4  ;;  %s1154_s9 = sshll.u32 %s213_s22, 7  ;;  %s1990_s7 = int_to_ptr.vmem [resolvable:$true] %s216_s7 }
  0x73   : > { %s1995_s5 = scalar_lea.hbm %s2336_s2, %s1154_s9  ;;  %p2384_p9 = scmp.lt.s32.totalorder %s1681_s25, 4 }
  0x74   : > { %s1497_s27 = scalar_lea.hbm %s1995_s5, 8192  ;;  %s1502_s8 = scalar_lea.hbm %s2336_s2, 32768 }
  0x75   : > { %p2001_p13 = pnand %p2384_p9, %p1964_p2  ;;  %p1498_p4 = scmp.ne.s32.totalorder %s1995_s5, %s1497_s27 }
  0x76   : > { %p1503_p2 = scmp.lt.u32.totalorder %s1995_s5, %s2336_s2  ;;  %p1504_p11 = scmp.lt.u32.totalorder %s1502_s8, %s1497_s27 }
  0x77   : > { %p1499_p10 = pneg %p2001_p13  ;;  %p1506_p5 = scmp.lt.u32.totalorder %s1497_s27, %s1995_s5 }
  0x78   : > { %p1505_p12 = por %p1504_p11, %p1503_p2 }
  0x79   : > { %p1500_p8 = pnand %p1499_p10, %p1498_p4 }
  0x7a   : > { %p1507_p7 = por %p1506_p5, %p1505_p12 }
  0x7b   : > { %p1501_p3 = pneg %p1500_p8 }
  0x7d   : > { %p1508_p9 = pnand %p1507_p7, %p1501_p3 }
  0x7f   : > { %1511 = shalt.err (!%p1508_p9)
}
  0x80   : > { %s1512_s1 = scalar_lea.vmem %s1990_s7, 8192  ;;  %s1687_s9 = smov [#allocation7]  }
  0x81   : > { %p1513_p4 = scmp.ne.s32.totalorder %s1990_s7, %s1512_s1  ;;  %s1517_s30 = sshll.u32 %s1687_s9, 4  ;;  %s1518_s30 = int_to_ptr.vmem [resolvable:$false] %s1517_s30 }
  0x82   : > { %s1519_s0 = scalar_lea.vmem %s1518_s30, 16384  ;;  %p1520_p0 = scmp.lt.s32.totalorder %s1990_s7, %s1518_s30 }
  0x83   : > { %p1515_p8 = pnand %p1513_p4, %p1499_p10  ;;  %p1521_p2 = scmp.lt.s32.totalorder %s1519_s0, %s1512_s1 }
  0x85   : > { %p1516_p6 = pneg %p1515_p8  ;;  %p1522_p11 = por %p1521_p2, %p1520_p0 }
  0x87   : > { %p1523_p12 = pnand %p1522_p11, %p1516_p6 }
  0x89   : > { %1526 = shalt.err (!%p1523_p12)
}
  0x8a   : > { %s1688_s27 = smov 512   ;;  %s1689_s28 = smov 256  }
  0x8b   : > { %s1690_s8 = smov 16   ;;  %p2386_p10 = scmp.ne.s32.totalorder %s2363_s11, 0 }
  0x8c   : > { %1281 = dma.hbm_to_vmem [thread:$0]  (!%p2001_p13), %s1995_s5, 8192, %s1990_s7, %s1834_s10, %s1688_s27, %s1689_s28, %s1690_s8  }
  0x8d   : > { %228 = sbr.rel (%p2386_p10) target bundleno = 548 (0x224), region = 32  ;;  %s230_s18 = sand.u32 (!%p2386_p10), 1, %s1657_s19  }
  0x8e   : > { %s1156_s22 = sshll.u32 (!%p2386_p10), %s230_s18, 7  ;;  %s231_s1 = scalar_lea.sflag (!%p2386_p10), [#allocation3], %s230_s18 }
  0x8f   : > { %s2034_s9 = scalar_lea.vmem (!%p2386_p10), [#allocation2], %s1156_s22  ;;  %p2387_p0 = scmp.ne.s32.totalorder (!%p2386_p10), %s2367_s15, 0 }
  0x94   : > { %1612 = dma.done.wait (%p2387_p0), %s231_s1, 2048  }
  0x95   : > { %1614 = vsyncadd (%p2387_p0), %s231_s1, 4294965248  ;;  %s239_s6 = sand.u32 1, %s1781_s26   ;;  %s241_s10 = sand.u32 1, %s1645_s16  }
  0x96   : > { %s1157_s5 = sshll.u32 %s241_s10, 7  ;;  %s240_s11 = scalar_lea.sflag [#allocation6], %s239_s6 }
  0x97   : > { %s2042_s7 = scalar_lea.vmem [#allocation5], %s1157_s5  ;;  %p2388_p6 = scmp.ne.s32.totalorder %s2358_s4, 0 }
  0x99   : > { %1616 = dma.done.wait (%p2388_p6), %s240_s11, 2048  }
  0x9a   : > { %1618 = vsyncadd (%p2388_p6), %s240_s11, 4294965248  ;;  %s2049_s30 = sand.u32 1, %s1633_s13  }
  0x9b   : > { %s1158_s15 = sshll.u32 %s2049_s30, 9 }
  0x9c   : > { %s2052_s0 = scalar_lea.vmem [#allocation7], %s1158_s15 }
  0x9d   : > { %1620 = dma.done.wait (%p1978_p1), %s240_s11, 8192  }
  0x9e   : > { %1622 = vsyncadd (%p1978_p1), %s240_s11, 4294959104  ;;  %v1405_v0 = vld [vmem:[%s2042_s7 + $0x40] sm:$0xff]   ;;  %v1407_v2 = vld [vmem:[%s2042_s7 + $0x48] sm:$0xff]   ;;  %s2389_s26 = sld [smem:[#allocation15_spill]]  ;;  %s2390_s4 = sld [smem:[#allocation14_spill]] }
  0x9f   : > { %v1406_v1 = vld [vmem:[%s2042_s7] sm:$0xff]   ;;  %1200 = vmatprep.subr.bf16.mxu0 %v1405_v0  ;;  %1248 = vmatprep.subr.bf16.mxu1 %v1405_v0  ;;  %v1408_v3 = vld [vmem:[%s2042_s7 + $0x8] sm:$0xff]   ;;  %v1409_v4 = vld [vmem:[%s2042_s7 + $0x50] sm:$0xff]   ;;  %s1159_s21 = sshll.u32 %s2049_s30, 3  ;;  %s2391_s6 = sld [smem:[#allocation22_spill]] }
  0xa0   : > { %1201 = vmatpush3.bf16.xpose.msra.mxu0 %v1406_v1  ;;  %1256 = vmatpush3.bf16.xpose.msra.mxu1 %v1406_v1  ;;  %v1410_v5 = vld [vmem:[%s2042_s7 + $0x10] sm:$0xff]   ;;  %v1411_v6 = vld [vmem:[%s2042_s7 + $0x58] sm:$0xff]   ;;  %v1421_v7 = vld [vmem:[%s2034_s9] sm:$0xff]   ;;  %s284_s18 = scalar_lea.vmem [#allocation8], %s1159_s21  ;;  %s996_s5 = scalar_lea.sflag [#allocation4], %s2049_s30 }
  0xa1   : > { %1202 = vmatprep.subr.bf16.mxu0 %v1407_v2  ;;  %1249 = vmatprep.subr.bf16.mxu1 %v1407_v2  ;;  %v1425_v8 = vld [vmem:[%s2034_s9 + $0x40] sm:$0xff]   ;;  %v1412_v9 = vld [vmem:[%s2042_s7 + $0x18] sm:$0xff]   ;;  %v1415_v12 = vld [vmem:[%s2042_s7 + $0x68] sm:$0xff]   ;;  %s1011_s22 = sshll.u32 %s284_s18, 4  ;;  %p2392_p13 = scmp.ne.s32.totalorder %s2379_s29, 0  ;;  %s2258_s22 = int_to_ptr.vmem [resolvable:$true] %s1011_s22 }
  0xa2   : > { %1216 = vmatprep.mubr.bf16.mxu0 %v1421_v7  ;;  %1232 = vmatprep.mubr.bf16.mxu1 %v1425_v8  ;;  %v1413_v10 = vld [vmem:[%s2042_s7 + $0x60] sm:$0xff]   ;;  %v1416_v13 = vld [vmem:[%s2042_s7 + $0x28] sm:$0xff]   ;;  %v1417_v14 = vld [vmem:[%s2042_s7 + $0x70] sm:$0xff]   ;;  %s1527_s11 = scalar_lea.vmem %s2258_s22, 128 }
  0xa3   : > { %v1414_v11 = vld [vmem:[%s2042_s7 + $0x20] sm:$0xff]   ;;  %v1418_v15 = vld [vmem:[%s2042_s7 + $0x30] sm:$0xff]   ;;  %v1419_v16 = vld [vmem:[%s2042_s7 + $0x78] sm:$0xff]   ;;  %p1528_p1 = scmp.ne.s32.totalorder %s2258_s22, %s1527_s11 }
  0xa4   : > { %v1420_v17 = vld [vmem:[%s2042_s7 + $0x38] sm:$0xff]   ;;  %v1422_v18 = vld [vmem:[%s2034_s9 + $0x8] sm:$0xff]   ;;  %v1423_v20 = vld [vmem:[%s2034_s9 + $0x10] sm:$0xff]   ;;  %s1193_s27 = sshll.u32 %s2389_s26, 1  ;;  %s1691_s7 = smov [#allocation8]  }
  0xa5   : > { %v1427_v19 = vld [vmem:[%s2034_s9 + $0x48] sm:$0xff]   ;;  %v1429_v21 = vld [vmem:[%s2034_s9 + $0x50] sm:$0xff]   ;;  %v1424_v22 = vld [vmem:[%s2034_s9 + $0x18] sm:$0xff]   ;;  %s1007_s28 = sadd.s32 %s2390_s4, %s1193_s27  ;;  %p1529_p3 = pnand %p1528_p1, %p2392_p13 }
  0xa6   : > { %v1431_v23 = vld [vmem:[%s2034_s9 + $0x58] sm:$0xff]   ;;  %v1426_v24 = vld [vmem:[%s2034_s9 + $0x20] sm:$0xff]   ;;  %v1428_v26 = vld [vmem:[%s2034_s9 + $0x28] sm:$0xff]   ;;  %s1194_s8 = sshll.u32 %s1007_s28, 7  ;;  %s1531_s15 = sshll.u32 %s1691_s7, 4  ;;  %s1532_s15 = int_to_ptr.vmem [resolvable:$false] %s1531_s15 }
  0xa7   : > { %v1433_v25 = vld [vmem:[%s2034_s9 + $0x60] sm:$0xff]   ;;  %v1434_v27 = vld [vmem:[%s2034_s9 + $0x68] sm:$0xff]   ;;  %v1430_v28 = vld [vmem:[%s2034_s9 + $0x30] sm:$0xff]   ;;  %s2256_s10 = scalar_lea.hbm %s2391_s6, %s1194_s8  ;;  %p1530_p5 = pneg %p1529_p3 }
  0xa8   : > { %1203 = vmatpush3.bf16.xpose.msra.mxu0 %v1408_v3  ;;  %1257 = vmatpush3.bf16.xpose.msra.mxu1 %v1408_v3  ;;  %v1435_v29 = vld [vmem:[%s2034_s9 + $0x70] sm:$0xff]   ;;  %v1432_v30 = vld [vmem:[%s2034_s9 + $0x38] sm:$0xff]   ;;  %v739_v32 = vld [vmem:[%s2052_s0] sm:$0xff]  ;;  %p1534_p7 = scmp.lt.s32.totalorder %s2258_s22, %s1532_s15 }
  0xa9   : > { %1204 = vmatprep.subr.bf16.mxu0 %v1409_v4  ;;  %1250 = vmatprep.subr.bf16.mxu1 %v1409_v4  ;;  %v1436_v31 = vld [vmem:[%s2034_s9 + $0x78] sm:$0xff]   ;;  %v740_v33 = vld [vmem:[%s2052_s0 + $0x8] sm:$0xff]  ;;  %v741_v35 = vld [vmem:[%s2052_s0 + $0x10] sm:$0xff] }
  0xaa   : > { %v742_v39 = vld [vmem:[%s2052_s0 + $0x18] sm:$0xff]  ;;  %v743_v52 = vld [vmem:[%s2052_s0 + $0x20] sm:$0xff]  ;;  %v744_v54 = vld [vmem:[%s2052_s0 + $0x28] sm:$0xff] }
  0xab   : > { %v745_v57 = vld [vmem:[%s2052_s0 + $0x30] sm:$0xff]  ;;  %v746_v61 = vld [vmem:[%s2052_s0 + $0x38] sm:$0xff] }
  0xb0   : > { %1205 = vmatpush3.bf16.xpose.msra.mxu0 %v1410_v5  ;;  %1258 = vmatpush3.bf16.xpose.msra.mxu1 %v1410_v5 }
  0xb1   : > { %1206 = vmatprep.subr.bf16.mxu0 %v1411_v6  ;;  %1251 = vmatprep.subr.bf16.mxu1 %v1411_v6 }
  0xb8   : > { %1207 = vmatpush3.bf16.xpose.msra.mxu0 %v1412_v9  ;;  %1259 = vmatpush3.bf16.xpose.msra.mxu1 %v1412_v9 }
  0xb9   : > { %1208 = vmatprep.subr.bf16.mxu0 %v1413_v10  ;;  %1252 = vmatprep.subr.bf16.mxu1 %v1413_v10 }
  0xc0   : > { %1209 = vmatpush3.bf16.xpose.msra.mxu0 %v1414_v11  ;;  %1260 = vmatpush3.bf16.xpose.msra.mxu1 %v1414_v11 }
  0xc1   : > { %1210 = vmatprep.subr.bf16.mxu0 %v1415_v12  ;;  %1253 = vmatprep.subr.bf16.mxu1 %v1415_v12  ;;  %v747_v12 = vld [vmem:[%s2052_s0 + $0x40] sm:$0xff] }
  0xc8   : > { %1211 = vmatpush3.bf16.xpose.msra.mxu0 %v1416_v13  ;;  %1261 = vmatpush3.bf16.xpose.msra.mxu1 %v1416_v13 }
  0xc9   : > { %1212 = vmatprep.subr.bf16.mxu0 %v1417_v14  ;;  %1254 = vmatprep.subr.bf16.mxu1 %v1417_v14  ;;  %v748_v14 = vld [vmem:[%s2052_s0 + $0x48] sm:$0xff] }
  0xd0   : > { %1213 = vmatpush3.bf16.xpose.msra.mxu0 %v1418_v15  ;;  %1262 = vmatpush3.bf16.xpose.msra.mxu1 %v1418_v15 }
  0xd1   : > { %1214 = vmatprep.subr.bf16.mxu0 %v1419_v16  ;;  %1255 = vmatprep.subr.bf16.mxu1 %v1419_v16 }
  0xd8   : > { %1215 = vmatpush3.bf16.xpose.msra.mxu0 %v1420_v17  ;;  %1263 = vmatpush3.bf16.xpose.msra.mxu1 %v1420_v17  ;;  %v749_v17 = vld [vmem:[%s2052_s0 + $0x50] sm:$0xff] }
  0xdf   : > { %1217 = vmatmul.mubr.bf16.vlgmr.msra.gmra.mrb[0].mxu0 %v1421_v7  ;;  %1233 = vmatmul.mubr.bf16.vlgmr.msra.gmra.mrb[0].mxu1 %v1425_v8 }
  0xe0   : > { %1218 = vmatprep.mubr.bf16.mxu0 %v1422_v18  ;;  %1234 = vmatprep.mubr.bf16.mxu1 %v1427_v19 }
  0xe7   : > { %1219 = vmatmul.mubr.bf16.gmra.mrb[4].mxu0 %v1422_v18  ;;  %1235 = vmatmul.mubr.bf16.gmra.mrb[4].mxu1 %v1427_v19 }
  0xe8   : > { %1220 = vmatprep.mubr.bf16.mxu0 %v1423_v20  ;;  %1236 = vmatprep.mubr.bf16.mxu1 %v1429_v21 }
  0xef   : > { %1221 = vmatmul.mubr.bf16.gmra.mrb[8].mxu0 %v1423_v20  ;;  %1237 = vmatmul.mubr.bf16.gmra.mrb[8].mxu1 %v1429_v21  ;;  %v750_v21 = vld [vmem:[%s2052_s0 + $0x58] sm:$0xff] }
  0xf0   : > { %1222 = vmatprep.mubr.bf16.mxu0 %v1424_v22  ;;  %1238 = vmatprep.mubr.bf16.mxu1 %v1431_v23 }
  0xf7   : > { %1223 = vmatmul.mubr.bf16.gmra.mrb[12].mxu0 %v1424_v22  ;;  %1239 = vmatmul.mubr.bf16.gmra.mrb[12].mxu1 %v1431_v23 }
  0xf8   : > { %1224 = vmatprep.mubr.bf16.mxu0 %v1426_v24  ;;  %1240 = vmatprep.mubr.bf16.mxu1 %v1433_v25 }
  0xff   : > { %1225 = vmatmul.mubr.bf16.gmra.mrb[16].mxu0 %v1426_v24  ;;  %1241 = vmatmul.mubr.bf16.gmra.mrb[16].mxu1 %v1433_v25 }
 0x100   : > { %1226 = vmatprep.mubr.bf16.mxu0 %v1428_v26  ;;  %1242 = vmatprep.mubr.bf16.mxu1 %v1434_v27 }
 0x107   : > { %1227 = vmatmul.mubr.bf16.gmra.mrb[20].mxu0 %v1428_v26  ;;  %1243 = vmatmul.mubr.bf16.gmra.mrb[20].mxu1 %v1434_v27 }
 0x108   : > { %1228 = vmatprep.mubr.bf16.mxu0 %v1430_v28  ;;  %1244 = vmatprep.mubr.bf16.mxu1 %v1435_v29 }
 0x10f   : > { %1229 = vmatmul.mubr.bf16.gmra.mrb[24].mxu0 %v1430_v28  ;;  %1245 = vmatmul.mubr.bf16.gmra.mrb[24].mxu1 %v1435_v29 }
 0x110   : > { %1230 = vmatprep.mubr.bf16.mxu0 %v1432_v30  ;;  %1246 = vmatprep.mubr.bf16.mxu1 %v1436_v31 }
 0x117   : > { %1231 = vmatmul.mubr.bf16.gmra.mrb[28].mxu0 %v1432_v30  ;;  %1247 = vmatmul.mubr.bf16.gmra.mrb[28].mxu1 %v1436_v31 }
 0x1b2   : > { %v580_v34 = vpop.f32.mrb[0].mxu0  ;;  %v2093_v36 = vpop.f32.mrb[0].mxu1 }
 0x1b3   : > { %v803_v37 = vsub.f32 %v580_v34, %v739_v32  ;;  %v582_v38 = vpop.f32.mrb[1].mxu0  ;;  %v2096_v40 = vpop.f32.mrb[1].mxu1 }
 0x1b4   : > { %v804_v41 = vsub.f32 %v582_v38, %v740_v33  ;;  %v584_v42 = vpop.f32.mrb[2].mxu0  ;;  %v2098_v43 = vpop.f32.mrb[2].mxu1 }
 0x1b5   : > { %v805_v44 = vsub.f32 %v584_v42, %v741_v35  ;;  %v586_v45 = vpop.f32.mrb[3].mxu0  ;;  %v2100_v46 = vpop.f32.mrb[3].mxu1  ;;  %v867_v48 = vand.u32 2147483647, %v803_v37  ;;  %v751_v37 = vld [vmem:[%s2052_s0 + $0x60] sm:$0xff] }
 0x1b6   : > { %v806_v47 = vsub.f32 %v586_v45, %v742_v39  ;;  %v868_v50 = vand.u32 2147483647, %v804_v41  ;;  %v752_v39 = vld [vmem:[%s2052_s0 + $0x68] sm:$0xff] }
 0x1b7   : > { %v869_v49 = vand.u32 2147483647, %v805_v44  ;;  %v753_v44 = vld [vmem:[%s2052_s0 + $0x70] sm:$0xff] }
 0x1b8   : > { %v870_v51 = vand.u32 2147483647, %v806_v47 }
 0x1b9   : > { %v931_v53 = vadd.f32 %v869_v49, %v867_v48  ;;  %v754_v49 = vld [vmem:[%s2052_s0 + $0x78] sm:$0xff] }
 0x1ba   : > { %v962_v55 = vadd.f32 %v870_v51, %v868_v50  ;;  %v590_v56 = vpop.f32.mrb[4].mxu0  ;;  %v2105_v58 = vpop.f32.mrb[4].mxu1 }
 0x1bb   : > { %v807_v59 = vsub.f32 %v590_v56, %v743_v52  ;;  %v592_v60 = vpop.f32.mrb[5].mxu0  ;;  %v2108_v62 = vpop.f32.mrb[5].mxu1 }
 0x1bc   : > { %v808_v63 = vsub.f32 %v592_v60, %v744_v54  ;;  %v594_v0 = vpop.f32.mrb[6].mxu0  ;;  %v2110_v1 = vpop.f32.mrb[6].mxu1 }
 0x1bd   : > { %v871_v2 = vand.u32 2147483647, %v807_v59  ;;  %v809_v3 = vsub.f32 %v594_v0, %v745_v57  ;;  %v596_v4 = vpop.f32.mrb[7].mxu0  ;;  %v2112_v5 = vpop.f32.mrb[7].mxu1 }
 0x1be   : > { %v872_v6 = vand.u32 2147483647, %v808_v63  ;;  %v810_v7 = vsub.f32 %v596_v4, %v746_v61 }
 0x1bf   : > { %v932_v8 = vadd.f32 %v931_v53, %v871_v2  ;;  %v873_v9 = vand.u32 2147483647, %v809_v3  ;;  %v755_v3 = vld [vmem:[%s2052_s0 + $0x80] sm:$0xff] }
 0x1c0   : > { %v963_v10 = vadd.f32 %v962_v55, %v872_v6  ;;  %v874_v11 = vand.u32 2147483647, %v810_v7  ;;  %v756_v6 = vld [vmem:[%s2052_s0 + $0x88] sm:$0xff] }
 0x1c1   : > { %v933_v13 = vadd.f32 %v932_v8, %v873_v9  ;;  %v757_v9 = vld [vmem:[%s2052_s0 + $0x90] sm:$0xff] }
 0x1c2   : > { %v964_v15 = vadd.f32 %v963_v10, %v874_v11  ;;  %v600_v16 = vpop.f32.mrb[8].mxu0  ;;  %v2117_v18 = vpop.f32.mrb[8].mxu1 }
 0x1c3   : > { %v811_v19 = vsub.f32 %v600_v16, %v747_v12  ;;  %v602_v20 = vpop.f32.mrb[9].mxu0  ;;  %v2120_v22 = vpop.f32.mrb[9].mxu1 }
 0x1c4   : > { %v812_v23 = vsub.f32 %v602_v20, %v748_v14  ;;  %v604_v24 = vpop.f32.mrb[10].mxu0  ;;  %v2122_v25 = vpop.f32.mrb[10].mxu1 }
 0x1c5   : > { %v875_v26 = vand.u32 2147483647, %v811_v19  ;;  %v813_v27 = vsub.f32 %v604_v24, %v749_v17  ;;  %v606_v28 = vpop.f32.mrb[11].mxu0  ;;  %v2124_v29 = vpop.f32.mrb[11].mxu1 }
 0x1c6   : > { %v876_v30 = vand.u32 2147483647, %v812_v23  ;;  %v814_v31 = vsub.f32 %v606_v28, %v750_v21 }
 0x1c7   : > { %v934_v32 = vadd.f32 %v933_v13, %v875_v26  ;;  %v877_v33 = vand.u32 2147483647, %v813_v27  ;;  %v758_v13 = vld [vmem:[%s2052_s0 + $0x98] sm:$0xff] }
 0x1c8   : > { %v965_v34 = vadd.f32 %v964_v15, %v876_v30  ;;  %v878_v35 = vand.u32 2147483647, %v814_v31 }
 0x1c9   : > { %v935_v38 = vadd.f32 %v934_v32, %v877_v33  ;;  %v759_v32 = vld [vmem:[%s2052_s0 + $0xa0] sm:$0xff] }
 0x1ca   : > { %v966_v41 = vadd.f32 %v965_v34, %v878_v35  ;;  %v610_v42 = vpop.f32.mrb[12].mxu0  ;;  %v2129_v45 = vpop.f32.mrb[12].mxu1  ;;  %v760_v34 = vld [vmem:[%s2052_s0 + $0xa8] sm:$0xff] }
 0x1cb   : > { %v815_v47 = vsub.f32 %v610_v42, %v751_v37  ;;  %v612_v48 = vpop.f32.mrb[13].mxu0  ;;  %v2132_v50 = vpop.f32.mrb[13].mxu1 }
 0x1cc   : > { %v816_v51 = vsub.f32 %v612_v48, %v752_v39  ;;  %v614_v52 = vpop.f32.mrb[14].mxu0  ;;  %v2134_v53 = vpop.f32.mrb[14].mxu1 }
 0x1cd   : > { %v879_v54 = vand.u32 2147483647, %v815_v47  ;;  %v817_v55 = vsub.f32 %v614_v52, %v753_v44  ;;  %v616_v56 = vpop.f32.mrb[15].mxu0  ;;  %v2136_v57 = vpop.f32.mrb[15].mxu1  ;;  %v762_v44 = vld [vmem:[%s2052_s0 + $0xb8] sm:$0xff] }
 0x1ce   : > { %v880_v59 = vand.u32 2147483647, %v816_v51  ;;  %v818_v60 = vsub.f32 %v616_v56, %v754_v49 }
 0x1cf   : > { %v936_v61 = vadd.f32 %v935_v38, %v879_v54  ;;  %v881_v63 = vand.u32 2147483647, %v817_v55  ;;  %v761_v38 = vld [vmem:[%s2052_s0 + $0xb0] sm:$0xff] }
 0x1d0   : > { %v967_v0 = vadd.f32 %v966_v41, %v880_v59  ;;  %v882_v2 = vand.u32 2147483647, %v818_v60 }
 0x1d1   : > { %v937_v4 = vadd.f32 %v936_v61, %v881_v63 }
 0x1d2   : > { %v968_v7 = vadd.f32 %v967_v0, %v882_v2  ;;  %v620_v8 = vpop.f32.mrb[16].mxu0  ;;  %v2141_v10 = vpop.f32.mrb[16].mxu1 }
 0x1d3   : > { %v819_v11 = vsub.f32 %v620_v8, %v755_v3  ;;  %v622_v12 = vpop.f32.mrb[17].mxu0  ;;  %v2144_v14 = vpop.f32.mrb[17].mxu1  ;;  %v763_v3 = vld [vmem:[%s2052_s0 + $0xc0] sm:$0xff] }
 0x1d4   : > { %v820_v15 = vsub.f32 %v622_v12, %v756_v6  ;;  %v624_v16 = vpop.f32.mrb[18].mxu0  ;;  %v2146_v17 = vpop.f32.mrb[18].mxu1  ;;  %v764_v6 = vld [vmem:[%s2052_s0 + $0xc8] sm:$0xff] }
 0x1d5   : > { %v883_v19 = vand.u32 2147483647, %v819_v11  ;;  %v821_v20 = vsub.f32 %v624_v16, %v757_v9  ;;  %v626_v21 = vpop.f32.mrb[19].mxu0  ;;  %v2148_v23 = vpop.f32.mrb[19].mxu1  ;;  %v765_v9 = vld [vmem:[%s2052_s0 + $0xd0] sm:$0xff] }
 0x1d6   : > { %v884_v24 = vand.u32 2147483647, %v820_v15  ;;  %v822_v26 = vsub.f32 %v626_v21, %v758_v13  ;;  %v766_v15 = vld [vmem:[%s2052_s0 + $0xd8] sm:$0xff] }
 0x1d7   : > { %v938_v27 = vadd.f32 %v937_v4, %v883_v19  ;;  %v885_v28 = vand.u32 2147483647, %v821_v20 }
 0x1d8   : > { %v969_v30 = vadd.f32 %v968_v7, %v884_v24  ;;  %v886_v31 = vand.u32 2147483647, %v822_v26 }
 0x1d9   : > { %v939_v33 = vadd.f32 %v938_v27, %v885_v28 }
 0x1da   : > { %v970_v35 = vadd.f32 %v969_v30, %v886_v31  ;;  %v630_v37 = vpop.f32.mrb[20].mxu0  ;;  %v2153_v39 = vpop.f32.mrb[20].mxu1 }
 0x1db   : > { %v823_v41 = vsub.f32 %v630_v37, %v759_v32  ;;  %v632_v42 = vpop.f32.mrb[21].mxu0  ;;  %v2156_v47 = vpop.f32.mrb[21].mxu1  ;;  %v767_v37 = vld [vmem:[%s2052_s0 + $0xe0] sm:$0xff] }
 0x1dc   : > { %v824_v48 = vsub.f32 %v632_v42, %v760_v34  ;;  %v634_v49 = vpop.f32.mrb[22].mxu0  ;;  %v2158_v51 = vpop.f32.mrb[22].mxu1  ;;  %v771_v42 = vld [vmem:[%s2052_s0 + $0x100] sm:$0xff] }
 0x1dd   : > { %v887_v52 = vand.u32 2147483647, %v823_v41  ;;  %v825_v54 = vsub.f32 %v634_v49, %v761_v38  ;;  %v636_v55 = vpop.f32.mrb[23].mxu0  ;;  %v2160_v56 = vpop.f32.mrb[23].mxu1  ;;  %v768_v41 = vld [vmem:[%s2052_s0 + $0xe8] sm:$0xff]  ;;  %v769_v49 = vld [vmem:[%s2052_s0 + $0xf0] sm:$0xff] }
 0x1de   : > { %v888_v59 = vand.u32 2147483647, %v824_v48  ;;  %v826_v60 = vsub.f32 %v636_v55, %v762_v44 }
 0x1df   : > { %v940_v61 = vadd.f32 %v939_v33, %v887_v52  ;;  %v889_v63 = vand.u32 2147483647, %v825_v54  ;;  %v772_v54 = vld [vmem:[%s2052_s0 + $0x108] sm:$0xff] }
 0x1e0   : > { %v971_v0 = vadd.f32 %v970_v35, %v888_v59  ;;  %v890_v2 = vand.u32 2147483647, %v826_v60  ;;  %v770_v60 = vld [vmem:[%s2052_s0 + $0xf8] sm:$0xff] }
 0x1e1   : > { %v941_v4 = vadd.f32 %v940_v61, %v889_v63  ;;  %v773_v63 = vld [vmem:[%s2052_s0 + $0x110] sm:$0xff] }
 0x1e2   : > { %v972_v7 = vadd.f32 %v971_v0, %v890_v2  ;;  %v640_v8 = vpop.f32.mrb[24].mxu0  ;;  %v2165_v11 = vpop.f32.mrb[24].mxu1 }
 0x1e3   : > { %v827_v12 = vsub.f32 %v640_v8, %v763_v3  ;;  %v642_v13 = vpop.f32.mrb[25].mxu0  ;;  %v2168_v16 = vpop.f32.mrb[25].mxu1 }
 0x1e4   : > { %v828_v19 = vsub.f32 %v642_v13, %v764_v6  ;;  %v644_v20 = vpop.f32.mrb[26].mxu0  ;;  %v2170_v21 = vpop.f32.mrb[26].mxu1  ;;  %v774_v6 = vld [vmem:[%s2052_s0 + $0x118] sm:$0xff]  ;;  %v836_v13 = vsub.f32 %v2096_v40, %v772_v54 }
 0x1e5   : > { %v891_v24 = vand.u32 2147483647, %v827_v12  ;;  %v829_v26 = vsub.f32 %v644_v20, %v765_v9  ;;  %v646_v27 = vpop.f32.mrb[27].mxu0  ;;  %v2172_v28 = vpop.f32.mrb[27].mxu1  ;;  %v778_v40 = vld [vmem:[%s2052_s0 + $0x138] sm:$0xff] }
 0x1e6   : > { %v892_v30 = vand.u32 2147483647, %v828_v19  ;;  %v830_v31 = vsub.f32 %v646_v27, %v766_v15  ;;  %v775_v15 = vld [vmem:[%s2052_s0 + $0x120] sm:$0xff] }
 0x1e7   : > { %v942_v32 = vadd.f32 %v941_v4, %v891_v24  ;;  %v893_v33 = vand.u32 2147483647, %v829_v26  ;;  %v835_v4 = vsub.f32 %v2093_v36, %v771_v42  ;;  %v837_v24 = vsub.f32 %v2098_v43, %v773_v63  ;;  %v776_v26 = vld [vmem:[%s2052_s0 + $0x128] sm:$0xff]  ;;  %v779_v43 = vld [vmem:[%s2052_s0 + $0x140] sm:$0xff] }
 0x1e8   : > { %v973_v34 = vadd.f32 %v972_v7, %v892_v30  ;;  %v894_v35 = vand.u32 2147483647, %v830_v31  ;;  %v838_v36 = vsub.f32 %v2100_v46, %v774_v6  ;;  %v777_v31 = vld [vmem:[%s2052_s0 + $0x130] sm:$0xff]  ;;  %v840_v42 = vsub.f32 %v2108_v62, %v776_v26  ;;  %v780_v46 = vld [vmem:[%s2052_s0 + $0x148] sm:$0xff]  ;;  %v783_v6 = vld [vmem:[%s2052_s0 + $0x160] sm:$0xff] }
 0x1e9   : > { %v943_v38 = vadd.f32 %v942_v32, %v893_v33  ;;  %v843_v63 = vsub.f32 %v2117_v18, %v779_v43  ;;  %v786_v26 = vld [vmem:[%s2052_s0 + $0x178] sm:$0xff] }
 0x1ea   : > { %v974_v44 = vadd.f32 %v973_v34, %v894_v35  ;;  %v650_v48 = vpop.f32.mrb[28].mxu0  ;;  %v2178_v52 = vpop.f32.mrb[28].mxu1  ;;  %v899_v34 = vand.u32 2147483647, %v835_v4  ;;  %v839_v35 = vsub.f32 %v2105_v58, %v775_v15  ;;  %v902_v54 = vand.u32 2147483647, %v838_v36 }
 0x1eb   : > { %v831_v55 = vsub.f32 %v650_v48, %v767_v37  ;;  %v652_v59 = vpop.f32.mrb[29].mxu0  ;;  %v2182_v61 = vpop.f32.mrb[29].mxu1  ;;  %v901_v48 = vand.u32 2147483647, %v837_v24  ;;  %v844_v4 = vsub.f32 %v2120_v22, %v780_v46  ;;  %v847_v24 = vsub.f32 %v2129_v45, %v783_v6  ;;  %v789_v45 = vld [vmem:[%s2052_s0 + $0x190] sm:$0xff] }
 0x1ec   : > { %v832_v0 = vsub.f32 %v652_v59, %v768_v41  ;;  %v654_v2 = vpop.f32.mrb[30].mxu0  ;;  %v2185_v3 = vpop.f32.mrb[30].mxu1  ;;  %v900_v41 = vand.u32 2147483647, %v836_v13  ;;  %v781_v59 = vld [vmem:[%s2052_s0 + $0x150] sm:$0xff] }
 0x1ed   : > { %v895_v7 = vand.u32 2147483647, %v831_v55  ;;  %v833_v8 = vsub.f32 %v654_v2, %v769_v49  ;;  %v656_v9 = vpop.f32.mrb[31].mxu0  ;;  %v2189_v12 = vpop.f32.mrb[31].mxu1  ;;  %v841_v49 = vsub.f32 %v2110_v1, %v777_v31  ;;  %v842_v55 = vsub.f32 %v2112_v5, %v778_v40 }
 0x1ee   : > { %v896_v19 = vand.u32 2147483647, %v832_v0  ;;  %v834_v20 = vsub.f32 %v656_v9, %v770_v60  ;;  %v903_v60 = vand.u32 2147483647, %v839_v35  ;;  %v782_v0 = vld [vmem:[%s2052_s0 + $0x158] sm:$0xff]  ;;  %v784_v9 = vld [vmem:[%s2052_s0 + $0x168] sm:$0xff]  ;;  %v850_v35 = vsub.f32 %v2136_v57, %v786_v26 }
 0x1ef   : > { %v944_v27 = vadd.f32 %v943_v38, %v895_v7  ;;  %v897_v30 = vand.u32 2147483647, %v833_v8  ;;  %v904_v2 = vand.u32 2147483647, %v840_v42  ;;  %v905_v7 = vand.u32 2147483647, %v841_v49 }
 0x1f0   : > { %v975_v32 = vadd.f32 %v974_v44, %v896_v19  ;;  %v898_v33 = vand.u32 2147483647, %v834_v20  ;;  %v845_v8 = vsub.f32 %v2122_v25, %v781_v59  ;;  %v906_v13 = vand.u32 2147483647, %v842_v55  ;;  %v785_v19 = vld [vmem:[%s2052_s0 + $0x170] sm:$0xff]  ;;  %v787_v25 = vld [vmem:[%s2052_s0 + $0x180] sm:$0xff] }
 0x1f1   : > { %v945_v37 = vadd.f32 %v944_v27, %v897_v30  ;;  %v846_v15 = vsub.f32 %v2124_v29, %v782_v0  ;;  %v907_v20 = vand.u32 2147483647, %v843_v63  ;;  %v908_v27 = vand.u32 2147483647, %v844_v4  ;;  %v788_v29 = vld [vmem:[%s2052_s0 + $0x188] sm:$0xff]  ;;  %v794_v63 = vld [vmem:[%s2052_s0 + $0x1b8] sm:$0xff] }
 0x1f2   : > { %v976_v38 = vadd.f32 %v975_v32, %v898_v33  ;;  %v848_v30 = vsub.f32 %v2132_v50, %v784_v9  ;;  %v909_v31 = vand.u32 2147483647, %v845_v8  ;;  %v849_v32 = vsub.f32 %v2134_v53, %v785_v19  ;;  %v790_v50 = vld [vmem:[%s2052_s0 + $0x198] sm:$0xff]  ;;  %v791_v53 = vld [vmem:[%s2052_s0 + $0x1a0] sm:$0xff]  ;;  %v792_v57 = vld [vmem:[%s2052_s0 + $0x1a8] sm:$0xff] }
 0x1f3   : > { %v946_v44 = vadd.f32 %v945_v37, %v899_v34  ;;  %v910_v34 = vand.u32 2147483647, %v846_v15  ;;  %v911_v37 = vand.u32 2147483647, %v847_v24  ;;  %v854_v59 = vsub.f32 %v2148_v23, %v790_v50  ;;  %v796_v23 = vld [vmem:[%s2052_s0 + $0x1c8] sm:$0xff] }
 0x1f4   : > { %v977_v58 = vadd.f32 %v976_v38, %v900_v41  ;;  %v851_v41 = vsub.f32 %v2141_v10, %v787_v25  ;;  %v912_v43 = vand.u32 2147483647, %v848_v30  ;;  %v852_v38 = vsub.f32 %v2144_v14, %v788_v29  ;;  %v793_v10 = vld [vmem:[%s2052_s0 + $0x1b0] sm:$0xff]  ;;  %v802_v29 = vld [vmem:[%s2052_s0 + $0x1f8] sm:$0xff] }
 0x1f5   : > { %v947_v62 = vadd.f32 %v946_v44, %v901_v48  ;;  %v913_v49 = vand.u32 2147483647, %v849_v32  ;;  %v853_v44 = vsub.f32 %v2146_v17, %v789_v45  ;;  %v855_v14 = vsub.f32 %v2153_v39, %v791_v53 }
 0x1f6   : > { %v978_v1 = vadd.f32 %v977_v58, %v902_v54  ;;  %v914_v54 = vand.u32 2147483647, %v850_v35  ;;  %v915_v58 = vand.u32 2147483647, %v851_v41  ;;  %v916_v0 = vand.u32 2147483647, %v852_v38 }
 0x1f7   : > { %v948_v5 = vadd.f32 %v947_v62, %v903_v60  ;;  %v856_v17 = vsub.f32 %v2156_v47, %v792_v57  ;;  %v917_v6 = vand.u32 2147483647, %v853_v44  ;;  %v918_v8 = vand.u32 2147483647, %v854_v59  ;;  %v800_v47 = vld [vmem:[%s2052_s0 + $0x1e8] sm:$0xff] }
 0x1f8   : > { %v979_v18 = vadd.f32 %v978_v1, %v904_v2  ;;  %v795_v2 = vld [vmem:[%s2052_s0 + $0x1c0] sm:$0xff]  ;;  %v857_v1 = vsub.f32 %v2158_v51, %v793_v10  ;;  %v858_v9 = vsub.f32 %v2160_v56, %v794_v63  ;;  %v919_v15 = vand.u32 2147483647, %v855_v14 }
 0x1f9   : > { %v949_v22 = vadd.f32 %v948_v5, %v905_v7  ;;  %v797_v5 = vld [vmem:[%s2052_s0 + $0x1d0] sm:$0xff]  ;;  %v859_v19 = vsub.f32 %v2165_v11, %v795_v2  ;;  %v920_v24 = vand.u32 2147483647, %v856_v17  ;;  %v860_v26 = vsub.f32 %v2168_v16, %v796_v23 }
 0x1fa   : > { %v980_v36 = vadd.f32 %v979_v18, %v906_v13  ;;  %v799_v13 = vld [vmem:[%s2052_s0 + $0x1e0] sm:$0xff]  ;;  %v798_v18 = vld [vmem:[%s2052_s0 + $0x1d8] sm:$0xff]  ;;  %v864_v11 = vsub.f32 %v2182_v61, %v800_v47 }
 0x1fb   : > { %v950_v33 = vadd.f32 %v949_v22, %v907_v20  ;;  %v921_v22 = vand.u32 2147483647, %v857_v1  ;;  %v863_v56 = vsub.f32 %v2178_v52, %v799_v13  ;;  %v862_v25 = vsub.f32 %v2172_v28, %v798_v18 }
 0x1fc   : > { %v981_v40 = vadd.f32 %v980_v36, %v908_v27  ;;  %v861_v27 = vsub.f32 %v2170_v21, %v797_v5  ;;  %v922_v36 = vand.u32 2147483647, %v858_v9  ;;  %v928_v41 = vand.u32 2147483647, %v864_v11 }
 0x1fd   : > { %v951_v42 = vadd.f32 %v950_v33, %v909_v31  ;;  %v801_v31 = vld [vmem:[%s2052_s0 + $0x1f0] sm:$0xff]  ;;  %v923_v33 = vand.u32 2147483647, %v859_v19  ;;  %v927_v21 = vand.u32 2147483647, %v863_v56  ;;  %v866_v28 = vsub.f32 %v2189_v12, %v802_v29  ;;  %s1533_s0 = scalar_lea.vmem %s1532_s15, 256 }
 0x1fe   : > { %v982_v48 = vadd.f32 %v981_v40, %v910_v34  ;;  %v924_v34 = vand.u32 2147483647, %v860_v26  ;;  %v925_v40 = vand.u32 2147483647, %v861_v27  ;;  %v865_v45 = vsub.f32 %v2185_v3, %v801_v31  ;;  %p1535_p9 = scmp.lt.s32.totalorder %s1533_s0, %s1527_s11 }
 0x1ff   : > { %v952_v46 = vadd.f32 %v951_v42, %v911_v37  ;;  %v926_v37 = vand.u32 2147483647, %v862_v25 }
 0x200   : > { %v983_v55 = vadd.f32 %v982_v48, %v912_v43  ;;  %v929_v43 = vand.u32 2147483647, %v865_v45  ;;  %v930_v48 = vand.u32 2147483647, %v866_v28  ;;  %p1536_p4 = por %p1535_p9, %p1534_p7 }
 0x201   : > { %v953_v60 = vadd.f32 %v952_v46, %v913_v49 }
 0x202   : > { %v984_v62 = vadd.f32 %v983_v55, %v914_v54  ;;  %p1537_p8 = pnand %p1536_p4, %p1530_p5 }
 0x203   : > { %v954_v4 = vadd.f32 %v953_v60, %v915_v58 }
 0x204   : > { %v985_v7 = vadd.f32 %v984_v62, %v916_v0 }
 0x205   : > { %v955_v39 = vadd.f32 %v954_v4, %v917_v6 }
 0x206   : > { %v986_v20 = vadd.f32 %v985_v7, %v918_v8 }
 0x207   : > { %v956_v51 = vadd.f32 %v955_v39, %v919_v15 }
 0x208   : > { %v987_v30 = vadd.f32 %v986_v20, %v920_v24 }
 0x209   : > { %v957_v32 = vadd.f32 %v956_v51, %v921_v22 }
 0x20a   : > { %v988_v16 = vadd.f32 %v987_v30, %v922_v36 }
 0x20b   : > { %v958_v35 = vadd.f32 %v957_v32, %v923_v33 }
 0x20c   : > { %v989_v52 = vadd.f32 %v988_v16, %v924_v34 }
 0x20d   : > { %v959_v61 = vadd.f32 %v958_v35, %v925_v40 }
 0x20e   : > { %v990_v42 = vadd.f32 %v989_v52, %v926_v37 }
 0x20f   : > { %v960_v50 = vadd.f32 %v959_v61, %v927_v21 }
 0x210   : > { %v991_v38 = vadd.f32 %v990_v42, %v928_v41 }
 0x211   : > { %v961_v53 = vadd.f32 %v960_v50, %v929_v43 }
 0x212   : > { %v992_v3 = vadd.f32 %v991_v38, %v930_v48 }
 0x214   : > { %v993_v49 = vadd.f32 %v992_v3, %v961_v53 }
 0x216   : > { %994 = vst [vmem:[%s284_s18] sm:$0xff] %v993_v49 }
 0x217   : > { %1540 = shalt.err (!%p1537_p8)
}
 0x218   : > { %s1541_s30 = scalar_lea.hbm %s2256_s10, 128  ;;  %s1545_s21 = scalar_lea.hbm %s2391_s6, 512 }
 0x219   : > { %p1542_p2 = scmp.ne.s32.totalorder %s2256_s10, %s1541_s30  ;;  %p1546_p10 = scmp.lt.u32.totalorder %s2256_s10, %s2391_s6 }
 0x21a   : > { %p1547_p0 = scmp.lt.u32.totalorder %s1545_s21, %s1541_s30  ;;  %p1549_p1 = scmp.lt.u32.totalorder %s1541_s30, %s2256_s10 }
 0x21b   : > { %p1543_p11 = pnand %p1542_p2, %p2392_p13 }
 0x21c   : > { %p1548_p6 = por %p1547_p0, %p1546_p10 }
 0x21d   : > { %p1544_p12 = pneg %p1543_p11 }
 0x21e   : > { %p1550_p3 = por %p1549_p1, %p1548_p6 }
 0x220   : > { %p1551_p5 = pnand %p1550_p3, %p1544_p12 }
 0x222   : > { %1554 = shalt.err (!%p1551_p5)
}
 0x223   : > { %1270 = dma.vmem_to_hbm [thread:$0]  (%p2392_p13), %s2258_s22, 128, %s2256_s10, %s996_s5  }
 0x224 PF: > { %p1287_p7 = scmp.ge.s32.totalorder %s1681_s25, 2  ;;  %s1023_s8 = sand.u32 1, %s1629_s12  }
 0x225   : > { %p2393_p9 = scmp.ne.s32.totalorder %s2382_s17, 0  ;;  %s1024_s18 = scalar_lea.sflag [#allocation4], %s1023_s8 }
 0x227   : > { %p1283_p4 = pnand %p1287_p7, %p2393_p9 }
 0x229   : > { %1624 = dma.done.wait (!%p1283_p4), %s1024_s18, 128  }
 0x22a   : > { %1626 = vsyncadd (!%p1283_p4), %s1024_s18, 4294967168  ;;  %s22_s25 = sadd.s32 1, %s1681_s25   ;;  %s2395_s29 = sld [smem:[#allocation13_spill]] }
 0x22b   : > { %p2287_p8 = scmp.ge.s32.totalorder %s22_s25, 6   ;;  %s2396_s17 = sld [smem:[#allocation17_spill]] }
 0x22c   : > { %s2397_s22 = sld [smem:[#allocation19_spill]]  ;;  %s2398_s9 = sld [smem:[#allocation16_spill]] }
 0x22d   : > { %s2399_s10 = sld [smem:[#allocation18_spill]]  ;;  %s2400_s12 = smov %s1633_s13 }
 0x22e   : > { %s2401_s13 = smov %s1637_s14  ;;  %s2402_s14 = smov %s1960_s3 }
 0x22f   : > { %s2403_s15 = smov %s1645_s16  ;;  %s2405_s18 = smov %s1657_s19 }
 0x230   : > { %s2404_s16 = smov %s2395_s29  ;;  %s2406_s19 = smov %s1661_s20 }
 0x231   : > { %s2408_s21 = smov %s1673_s23  ;;  %21 = sbr.rel (!%p2287_p8) target bundleno = 16 (0x10), region = 101 }
 0x232   : > { %s2407_s20 = smov %s2397_s22  ;;  %s2409_s22 = smov %s1677_s24 }
 0x233   : > { %s2410_s23 = smov %s2398_s9  ;;  %s2411_s24 = smov %s2399_s10 }
 0x238   :  { %1029 = vsyncpa [#allocation3], 1 }
 0x239   :  { %1031 = vsyncpa [#allocation3 + $0x1], 1 }
 0x23a   :  { %1032 = vsyncpa [#allocation6], 1 }
 0x23b   :  { %1034 = vsyncpa [#allocation6 + $0x1], 1 }
 0x23c   :  { %1035 = vsyncpa [#allocation4], 1 }
 0x23d   :  { %1037 = vsyncpa [#allocation4 + $0x1], 1 }

</bundles_post_ra>
